<compile_context>
chip_gen: v6e
topology: v6e:2x2x1
jax: 0.10.0
libtpu: 0.0.40
codegen_flags: <defaults>
</compile_context>

<pallas_src>
import jax
import jax.numpy as jnp
from jax import lax
from jax.experimental import pallas as pl
from jax.experimental.pallas import tpu as pltpu

D_IMG = 384        # d_embed[0]
D_TXT = 768        # d_embed[1]
N_CLASSES = 5
N_PATCH = 100      # hard-coded "100" in .view(-1, 100, n_classes)
C_PAD = 128        # class axis zero-padded to one full lane tile
BT_PAD = 128       # text-batch (logits N) axis padded to one full lane tile


def text_embed_kernel(txtf_ref, wt_ref, bt_ref, out_ref):
    # txtf_ref: (BT_PAD, 768) f32   wt_ref: (768, C_PAD) bf16   bt_ref: (1, C_PAD) f32
    # out_ref : (C_PAD, BT_PAD) bf16 — embeddings emitted pre-transposed so the
    # image kernel's logits tail is a clean A @ B with no per-step relayout.
    te = jnp.dot(txtf_ref[...].astype(jnp.bfloat16), wt_ref[...],
                 preferred_element_type=jnp.float32) + bt_ref[...]
    te = te * lax.rsqrt(jnp.sum(te * te, axis=-1, keepdims=True))
    out_ref[...] = te.T.astype(jnp.bfloat16)


def image_logits_kernel(imgf_ref, wi_ref, bi_ref, txt_t_ref, out_ref):
    # imgf_ref : (tb, 100, 384) f32 (read straight from HBM, no wrapper cast)
    # wi_ref   : (384, C_PAD) bf16 (resident)   bi_ref: (1, C_PAD) f32 (resident)
    # txt_t_ref: (C_PAD, BT_PAD) bf16 (resident)
    # out_ref  : (tb, BT_PAD) f32 (lane-dense store)
    # Mean over the 100 patch rows first (projection commutes with the mean);
    # the reduce consumes the f32 tile in place — no full-tile copy in VMEM.
    pooled = jnp.sum(imgf_ref[...], axis=1) * (1.0 / N_PATCH)          # (tb, 384) f32
    ie = jnp.dot(pooled.astype(jnp.bfloat16), wi_ref[...],
                 preferred_element_type=jnp.float32) + bi_ref[...]     # (tb, C_PAD) f32
    ie = ie * lax.rsqrt(jnp.sum(ie * ie, axis=-1, keepdims=True))
    out_ref[...] = jnp.dot(ie.astype(jnp.bfloat16), txt_t_ref[...],
                           preferred_element_type=jnp.float32)


def clip_head(img_features, w_img, b_img, text_pooled, w_txt, b_txt):
    """img_features: (B*100, 384) f32; text_pooled: (Bt, 768) f32.
    w_* in native nn.Linear layout (out=5, in); b_* (5,).  Returns (B, Bt) f32."""
    rows = img_features.shape[0]
    assert rows % N_PATCH == 0
    B = rows // N_PATCH
    Bt = text_pooled.shape[0]
    assert Bt <= BT_PAD

    bf = jnp.bfloat16
    # zero-pad the 5-class axis to a full 128-lane tile (padding columns are
    # exactly zero, so L2 norms and the logits contraction are unchanged).
    wi_pad = jnp.zeros((D_IMG, C_PAD), bf).at[:, :N_CLASSES].set(w_img.T.astype(bf))
    bi_pad = jnp.zeros((1, C_PAD), jnp.float32).at[0, :N_CLASSES].set(
        b_img.astype(jnp.float32))
    wt_pad = jnp.zeros((D_TXT, C_PAD), bf).at[:, :N_CLASSES].set(w_txt.T.astype(bf))
    bt_pad = jnp.zeros((1, C_PAD), jnp.float32).at[0, :N_CLASSES].set(
        b_txt.astype(jnp.float32))

    vmem = pl.BlockSpec(memory_space=pltpu.MemorySpace.VMEM)

    # --- text branch: tiny single-shot kernel; emits (C_PAD, BT_PAD) bf16,
    # already transposed into the layout the image kernel consumes ---
    txt_pad = text_pooled.astype(jnp.float32)
    if Bt < BT_PAD:
        # padded rows project to the bias (nonzero) -> no NaN from the rsqrt;
        # their logits columns are sliced off below.
        txt_pad = jnp.pad(txt_pad, ((0, BT_PAD - Bt), (0, 0)))
    txt_t = pl.pallas_call(
        text_embed_kernel,
        out_shape=jax.ShapeDtypeStruct((C_PAD, BT_PAD), bf),
        in_specs=[vmem, vmem, vmem],
        out_specs=vmem,
    )(txt_pad, wt_pad, bt_pad)

    # --- image branch: grid over blocks of tb images (tb*100 patch rows) ---
    # tb cap 64: f32 tile = 64*100*384*4 ~= 9.8 MiB, ~20 MiB double-buffered —
    # comfortably under v7x's 64 MiB VMEM.  On v5e/v6e (128 MiB) raise to 128-256.
    TB_CAP = 64
    B_sub = ((B + 7) // 8) * 8                 # sublane-align the image axis
    tb = min(B_sub, TB_CAP)
    B_pad = pl.cdiv(B, tb) * tb
    imgf3d = img_features.reshape(B, N_PATCH, D_IMG).astype(jnp.float32)
    if B_pad != B:
        # zero patch rows -> pooled = 0 -> embed = bias (nonzero) -> no NaN;
        # padded logits rows are sliced off below.
        imgf3d = jnp.pad(imgf3d, ((0, B_pad - B), (0, 0), (0, 0)))

    logits_pad = pl.pallas_call(
        image_logits_kernel,
        out_shape=jax.ShapeDtypeStruct((B_pad, BT_PAD), jnp.float32),
        grid=(B_pad // tb,),
        in_specs=[
            pl.BlockSpec((tb, N_PATCH, D_IMG), lambda i: (i, 0, 0)),
            pl.BlockSpec((D_IMG, C_PAD), lambda i: (0, 0)),   # resident weights
            pl.BlockSpec((1, C_PAD), lambda i: (0, 0)),       # resident bias
            pl.BlockSpec((C_PAD, BT_PAD), lambda i: (0, 0)),  # resident text emb
        ],
        out_specs=pl.BlockSpec((tb, BT_PAD), lambda i: (i, 0)),
        compiler_params=pltpu.CompilerParams(
            dimension_semantics=("parallel",),       # megacore-shard on v7x
            vmem_limit_bytes=48 * 1024 * 1024),      # headroom under v7x 64 MiB
    )(imgf3d, wi_pad, bi_pad, txt_t)

    return logits_pad[:B, :Bt]


def ref_forward(img_features, w_img, b_img, text_pooled, w_txt, b_txt):
    """Plain-JAX mirror of the PyTorch forward (f32, project-then-mean)."""
    ie = (img_features @ w_img.T + b_img).reshape(-1, N_PATCH, N_CLASSES).mean(axis=1)
    ie = ie / jnp.linalg.norm(ie, axis=-1, keepdims=True)
    te = text_pooled @ w_txt.T + b_txt
    te = te / jnp.linalg.norm(te, axis=-1, keepdims=True)
    return ie @ te.T


def ref_forward_matched(img_features, w_img, b_img, text_pooled, w_txt, b_txt):
    """Mirror of the kernel's numerics (f32 pooling, bf16 matmul operands,
    f32 accumulation, pool-before-project) for a tight correctness check."""
    bf = jnp.bfloat16
    B = img_features.shape[0] // N_PATCH
    pooled = img_features.reshape(B, N_PATCH, D_IMG).sum(axis=1) * (1.0 / N_PATCH)
    ie = jnp.dot(pooled.astype(bf), w_img.T.astype(bf),
                 preferred_element_type=jnp.float32) + b_img
    ie = ie * lax.rsqrt(jnp.sum(ie * ie, axis=-1, keepdims=True))
    te = jnp.dot(text_pooled.astype(bf), w_txt.T.astype(bf),
                 preferred_element_type=jnp.float32) + b_txt
    te = te * lax.rsqrt(jnp.sum(te * te, axis=-1, keepdims=True))
    return jnp.dot(ie.astype(bf), te.astype(bf).T,
                   preferred_element_type=jnp.float32)


if __name__ == "__main__":
    key = jax.random.PRNGKey(0)
    k = jax.random.split(key, 8)

    B, Bt = 16, 3                # image batch (x100 patches each), text batch
    C_in, H, W = 3, 16, 16       # NCHW image input to the (stub) image encoder
    seq, vocab = 8, 32

    img = jax.random.normal(k[0], (B * N_PATCH, C_in, H, W), jnp.float32)   # NCHW
    text_ids = jax.random.randint(k[1], (Bt, seq), 0, vocab)

    # TODO(synk): ImageEncoder / TextEncoder are constructor-injected external
    # nn.Modules; replaced by deterministic plain-JAX stubs producing the
    # documented feature shapes (B*100, 384) and pooler_output (Bt, 768).
    w_enc_img = jax.random.normal(k[2], (C_in * H * W, D_IMG), jnp.float32) * 0.02
    img_features = img.reshape(B * N_PATCH, -1) @ w_enc_img                 # (B*100, 384)

    tok_emb = jax.random.normal(k[3], (vocab, D_TXT), jnp.float32) * 0.02
    text_pooled = jnp.tanh(jnp.mean(tok_emb[text_ids], axis=1))             # (Bt, 768)

    # CLIP head parameters (nn.Linear native layout: weight (out,in), bias (out,))
    w_img = jax.random.normal(k[4], (N_CLASSES, D_IMG), jnp.float32) / jnp.sqrt(D_IMG)
    b_img = jax.random.normal(k[5], (N_CLASSES,), jnp.float32) * 0.01
    w_txt = jax.random.normal(k[6], (N_CLASSES, D_TXT), jnp.float32) / jnp.sqrt(D_TXT)
    b_txt = jax.random.normal(k[7], (N_CLASSES,), jnp.float32) * 0.01

    logits = clip_head(img_features, w_img, b_img, text_pooled, w_txt, b_txt)
    logits = jax.block_until_ready(logits)
    assert logits.shape == (B, Bt)

    # tight check vs. a reference that matches the kernel's bf16/f32 numerics
    ref_m = ref_forward_matched(img_features, w_img, b_img,
                                text_pooled, w_txt, b_txt)
    assert jnp.allclose(logits, ref_m, atol=1e-3, rtol=1e-3), (logits, ref_m)

    # looser check vs. the pure-f32 mirror of the PyTorch module
    # (slack covers bf16 MXU-operand rounding only; inputs stay f32 now)
    ref = ref_forward(img_features, w_img, b_img, text_pooled, w_txt, b_txt)
    assert jnp.allclose(logits, ref, atol=5e-2, rtol=5e-2), (logits, ref)

    print("KERNEL_OK")
</pallas_src>

<mosaic_0001>
module attributes {stable_mosaic.version = 11 : i64} {
  func.func @text_embed_kernel(%arg0: memref<128x768xf32, #tpu.memory_space<vmem>>, %arg1: memref<768x128xbf16, #tpu.memory_space<vmem>>, %arg2: memref<1x128xf32, #tpu.memory_space<vmem>>, %arg3: memref<128x128xbf16, #tpu.memory_space<vmem>>) attributes {dimension_semantics = [], scalar_prefetch = 0 : i64, scratch_operands = 0 : i64, tpu.core_type = #tpu.core_type<tc>} {
    %c0 = arith.constant 0 : index
    %c0_0 = arith.constant 0 : index
    %0 = vector.load %arg0[%c0, %c0_0] : memref<128x768xf32, #tpu.memory_space<vmem>>, vector<128x768xf32>
    %1 = arith.truncf %0 : vector<128x768xf32> to vector<128x768xbf16>
    %c0_1 = arith.constant 0 : index
    %c0_2 = arith.constant 0 : index
    %2 = vector.load %arg1[%c0_1, %c0_2] : memref<768x128xbf16, #tpu.memory_space<vmem>>, vector<768x128xbf16>
    %cst = arith.constant dense<0.000000e+00> : vector<128x128xf32>
    %3 = tpu.matmul %1, %2, %cst {dimension_numbers = #tpu.dot_dimension_numbers<[1], [0], [0], [1], [0, 0, 1, 1], [], []>} : vector<128x768xbf16>, vector<768x128xbf16>, vector<128x128xf32> -> vector<128x128xf32>
    %c0_3 = arith.constant 0 : index
    %c0_4 = arith.constant 0 : index
    %4 = vector.load %arg2[%c0_3, %c0_4] : memref<1x128xf32, #tpu.memory_space<vmem>>, vector<1x128xf32>
    %5 = vector.broadcast %4 : vector<1x128xf32> to vector<128x128xf32>
    %6 = arith.addf %3, %5 : vector<128x128xf32>
    %7 = arith.mulf %6, %6 : vector<128x128xf32>
    %cst_5 = arith.constant dense<0.000000e+00> : vector<128xf32>
    %8 = vector.multi_reduction <add>, %7, %cst_5 [1] : vector<128x128xf32> to vector<128xf32>
    %9 = vector.shape_cast %8 : vector<128xf32> to vector<128x1xf32>
    %10 = math.rsqrt %9 : vector<128x1xf32>
    %11 = vector.broadcast %10 : vector<128x1xf32> to vector<128x128xf32>
    %12 = arith.mulf %6, %11 : vector<128x128xf32>
    %13 = tpu.transpose %12, [1, 0] : vector<128x128xf32> -> vector<128x128xf32>
    %14 = arith.truncf %13 : vector<128x128xf32> to vector<128x128xbf16>
    %c0_6 = arith.constant 0 : index
    %c0_7 = arith.constant 0 : index
    %15 = vector.load %arg3[%c0_6, %c0_7] : memref<128x128xbf16, #tpu.memory_space<vmem>>, vector<128x128xbf16>
    tpu.vector_store %arg3[%c0_6, %c0_7], %14 {strides = array<i32>} : memref<128x128xbf16, #tpu.memory_space<vmem>>, vector<128x128xbf16>,
    return
  }
}

</mosaic_0001>

<bundles_post_ra>
// kernel: tpu_custom_call.1
= control target key start
LH: loop header
LB: loop body
LE: loop exit
PB: predicated region body
PF: predicated region fallthrough
CT: control target
= control target key end

     0   :  { %8 = vsyncpa [#allocation3], 0  ;;  %s1775_s0 = inlined_call_operand.hbm [shape: f32[128,768], index: 0, kind: input, shape index: {}]   ;;  %s1776_s1 = inlined_call_operand.hbm [shape: bf16[768,128], index: 1, kind: input, shape index: {}]   ;;  %s1777_s2 = inlined_call_operand.vmem [shape: f32[1,128], index: 2, kind: input, shape index: {}]   ;;  %s1778_s3 = inlined_call_operand.hbm [shape: bf16[128,128], index: 3, kind: output, shape index: {}]  }
   0x1   :  { %9 = vsyncpa [#allocation6], 0 }
   0x2   :  { %10 = vsyncpa [#allocation4], 0  ;;  %s1569_s12 = smov [#allocation2]  }
   0x3   :  { %s16_s13 = sshll.u32 %s1569_s12, 4  ;;  %s17_s13 = int_to_ptr.vmem [resolvable:$true] %s16_s13 }
   0x4   :  { %s1511_s14 = scalar_lea.vmem %s17_s13, 12288  ;;  %p1516_p1 = scmp.lt.s32.totalorder %s17_s13, %s17_s13 }
   0x5   :  { %p1512_p0 = scmp.ne.s32.totalorder %s17_s13, %s1511_s14  ;;  %p1517_p2 = scmp.lt.s32.totalorder %s1511_s14, %s1511_s14 }
   0x7   :  { %p1518_p3 = por %p1517_p2, %p1516_p1 }
   0x9   :  { %p1519_p4 = pnand %p1518_p3, %p1512_p0 }
   0xb   :  { %1522 = shalt.err (!%p1519_p4)
}
   0xc   :  { %s1570_s15 = smov 768   ;;  %s1571_s16 = smov 48  }
   0xd   :  { %22 = dma.hbm_to_vmem [thread:$0]  %s1775_s0, 12288, %s17_s13, [#allocation3], %s1570_s15, %s1570_s15, %s1571_s16  }
   0xe   :  { %s1572_s19 = smov [#allocation5]  }
   0xf   :  { %s28_s20 = sshll.u32 %s1572_s19, 4  ;;  %s29_s20 = int_to_ptr.vmem [resolvable:$true] %s28_s20 }
  0x10   :  { %s1531_s21 = scalar_lea.vmem %s29_s20, 6144  ;;  %p1536_p6 = scmp.lt.s32.totalorder %s29_s20, %s29_s20 }
  0x11   :  { %p1532_p5 = scmp.ne.s32.totalorder %s29_s20, %s1531_s21  ;;  %p1537_p7 = scmp.lt.s32.totalorder %s1531_s21, %s1531_s21 }
  0x13   :  { %p1538_p8 = por %p1537_p7, %p1536_p6 }
  0x15   :  { %p1539_p9 = pnand %p1538_p8, %p1532_p5 }
  0x17   :  { %1542 = shalt.err (!%p1539_p9)
}
  0x18   :  { %s1573_s22 = smov 64   ;;  %s1574_s23 = smov 4  }
  0x19   :  { %34 = dma.hbm_to_vmem [thread:$0]  %s1776_s1, 6144, %s29_s20, [#allocation6], %s1573_s22, %s1573_s22, %s1574_s23  }
  0x1a   :  { %1563 = dma.done.wait [#allocation3], 12288  }
  0x1b   :  { %1564 = vsyncadd [#allocation3], 4294955008 }
  0x1c   :  { %1565 = dma.done.wait [#allocation6], 6144  }
  0x1d   :  { %1566 = vsyncadd [#allocation6], 4294961152  ;;  %v1423_v0 = vld [vmem:[#allocation5 + $0x78] sm:$0xff]   ;;  %v1425_v2 = vld [vmem:[#allocation5 + $0x70] sm:$0xff]  }
  0x1e   :  { %v1424_v1 = vld [vmem:[#allocation5 + $0x38] sm:$0xff]   ;;  %1208 = vmatprep.subr.bf16.mxu0 %v1423_v0  ;;  %1400 = vmatprep.subr.bf16.mxu1 %v1423_v0  ;;  %v1426_v3 = vld [vmem:[#allocation5 + $0x30] sm:$0xff]   ;;  %v1427_v4 = vld [vmem:[#allocation5 + $0x68] sm:$0xff]  }
  0x1f   :  { %1209 = vmatpush3.bf16.msra.mxu0 %v1424_v1  ;;  %1408 = vmatpush3.bf16.msra.mxu1 %v1424_v1  ;;  %v1428_v5 = vld [vmem:[#allocation5 + $0x28] sm:$0xff]   ;;  %v1429_v6 = vld [vmem:[#allocation5 + $0x60] sm:$0xff]   ;;  %v1431_v8 = vld [vmem:[#allocation5 + $0x58] sm:$0xff]  }
  0x20   :  { %1210 = vmatprep.subr.bf16.mxu0 %v1425_v2  ;;  %1401 = vmatprep.subr.bf16.mxu1 %v1425_v2  ;;  %v1430_v7 = vld [vmem:[#allocation5 + $0x20] sm:$0xff]   ;;  %v1432_v9 = vld [vmem:[#allocation5 + $0x18] sm:$0xff]   ;;  %v1433_v10 = vld [vmem:[#allocation5 + $0x50] sm:$0xff]  }
  0x21   :  { %v45_v11 = vld [vmem:[#allocation2 + $0x8] sm:$0xff]  ;;  %v51_v12 = vld [vmem:[#allocation2 + $0x38] sm:$0xff]  ;;  %v1434_v17 = vld [vmem:[#allocation5 + $0x10] sm:$0xff]  }
  0x22   :  { %v93_v13 = vld [vmem:[#allocation2 + $0x188] sm:$0xff]  ;;  %v141_v14 = vpack.c.bf16 %v51_v12, %v45_v11  ;;  %v99_v15 = vld [vmem:[#allocation2 + $0x1b8] sm:$0xff]  ;;  %v1437_v20 = vld [vmem:[#allocation5 + $0x40] sm:$0xff]  }
  0x23   :  { %1211 = vmatpush3.bf16.msra.mxu0 %v1426_v3  ;;  %1409 = vmatpush3.bf16.msra.mxu1 %v1426_v3  ;;  %v165_v16 = vpack.c.bf16 %v99_v15, %v93_v13  ;;  %v1435_v18 = vld [vmem:[#allocation5 + $0x48] sm:$0xff]   ;;  %v1438_v21 = vld [vmem:[#allocation5] sm:$0xff]   ;;  %v50_v23 = vld [vmem:[#allocation2 + $0x30] sm:$0xff] }
  0x24   :  { %1212 = vmatprep.subr.bf16.mxu0 %v1427_v4  ;;  %1402 = vmatprep.subr.bf16.mxu1 %v1427_v4  ;;  %v1436_v19 = vld [vmem:[#allocation5 + $0x8] sm:$0xff]   ;;  %v44_v22 = vld [vmem:[#allocation2] sm:$0xff]  ;;  %v98_v25 = vld [vmem:[#allocation2 + $0x1b0] sm:$0xff] }
  0x25   :  { %611 = vmatprep.mubr.bf16.mxu0 %v141_v14  ;;  %643 = vmatprep.mubr.bf16.mxu1 %v165_v16  ;;  %v92_v24 = vld [vmem:[#allocation2 + $0x180] sm:$0xff]  ;;  %v1439_v26 = vld [vmem:[#allocation5 + $0xf8] sm:$0xff]   ;;  %v57_v28 = vld [vmem:[#allocation2 + $0x68] sm:$0xff]  ;;  %v140_v33 = vpack.c.bf16 %v50_v23, %v44_v22 }
  0x26   :  { %v1440_v27 = vld [vmem:[#allocation5 + $0x178] sm:$0xff]   ;;  %v105_v32 = vld [vmem:[#allocation2 + $0x1e8] sm:$0xff]  ;;  %v164_v34 = vpack.c.bf16 %v98_v25, %v92_v24  ;;  %v1443_v36 = vld [vmem:[#allocation5 + $0xf0] sm:$0xff]  }
  0x27   :  { %1213 = vmatpush3.bf16.msra.mxu0 %v1428_v5  ;;  %1410 = vmatpush3.bf16.msra.mxu1 %v1428_v5  ;;  %v63_v29 = vld [vmem:[#allocation2 + $0x98] sm:$0xff]  ;;  %v1444_v37 = vld [vmem:[#allocation5 + $0x170] sm:$0xff]   ;;  %v56_v42 = vld [vmem:[#allocation2 + $0x60] sm:$0xff] }
  0x28   :  { %1214 = vmatprep.subr.bf16.mxu0 %v1429_v6  ;;  %1403 = vmatprep.subr.bf16.mxu1 %v1429_v6  ;;  %v1441_v30 = vld [vmem:[#allocation5 + $0xb8] sm:$0xff]   ;;  %v1445_v38 = vld [vmem:[#allocation5 + $0xb0] sm:$0xff]   ;;  %v147_v40 = vpack.c.bf16 %v63_v29, %v57_v28  ;;  %v104_v44 = vld [vmem:[#allocation2 + $0x1e0] sm:$0xff] }
  0x29   :  { %v1442_v31 = vld [vmem:[#allocation5 + $0x138] sm:$0xff]   ;;  %v1446_v39 = vld [vmem:[#allocation5 + $0x130] sm:$0xff]   ;;  %v1447_v46 = vld [vmem:[#allocation5 + $0xe8] sm:$0xff]  }
  0x2a   :  { %v111_v35 = vld [vmem:[#allocation2 + $0x218] sm:$0xff]  ;;  %v62_v43 = vld [vmem:[#allocation2 + $0x90] sm:$0xff]  ;;  %v1448_v47 = vld [vmem:[#allocation5 + $0x168] sm:$0xff]  }
  0x2b   :  { %1215 = vmatpush3.bf16.msra.mxu0 %v1430_v7  ;;  %1411 = vmatpush3.bf16.msra.mxu1 %v1430_v7  ;;  %v171_v41 = vpack.c.bf16 %v111_v35, %v105_v32  ;;  %v110_v45 = vld [vmem:[#allocation2 + $0x210] sm:$0xff]  ;;  %v69_v48 = vld [vmem:[#allocation2 + $0xc8] sm:$0xff]  ;;  %v146_v49 = vpack.c.bf16 %v62_v43, %v56_v42  ;;  %v75_v51 = vld [vmem:[#allocation2 + $0xf8] sm:$0xff] }
  0x2c   :  { %1216 = vmatprep.subr.bf16.mxu0 %v1431_v8  ;;  %1404 = vmatprep.subr.bf16.mxu1 %v1431_v8  ;;  %v170_v50 = vpack.c.bf16 %v110_v45, %v104_v44  ;;  %v117_v52 = vld [vmem:[#allocation2 + $0x248] sm:$0xff]  ;;  %v123_v53 = vld [vmem:[#allocation2 + $0x278] sm:$0xff]  ;;  %v1451_v56 = vld [vmem:[#allocation5 + $0xe0] sm:$0xff]   ;;  %v153_v60 = vpack.c.bf16 %v75_v51, %v69_v48 }
  0x2d   :  { %v1449_v54 = vld [vmem:[#allocation5 + $0xa8] sm:$0xff]   ;;  %v1452_v57 = vld [vmem:[#allocation5 + $0x160] sm:$0xff]   ;;  %v177_v61 = vpack.c.bf16 %v123_v53, %v117_v52  ;;  %v74_v63 = vld [vmem:[#allocation2 + $0xf0] sm:$0xff] }
  0x2e   :  { %v1450_v55 = vld [vmem:[#allocation5 + $0x128] sm:$0xff]   ;;  %v1453_v58 = vld [vmem:[#allocation5 + $0xa0] sm:$0xff]   ;;  %v122_v1 = vld [vmem:[#allocation2 + $0x270] sm:$0xff] }
  0x2f   :  { %1217 = vmatpush3.bf16.msra.mxu0 %v1432_v9  ;;  %1412 = vmatpush3.bf16.msra.mxu1 %v1432_v9  ;;  %v1454_v59 = vld [vmem:[#allocation5 + $0x120] sm:$0xff]   ;;  %v1455_v2 = vld [vmem:[#allocation5 + $0xd8] sm:$0xff]   ;;  %v1459_v8 = vld [vmem:[#allocation5 + $0xd0] sm:$0xff]  }
  0x30   :  { %1218 = vmatprep.subr.bf16.mxu0 %v1433_v10  ;;  %1405 = vmatprep.subr.bf16.mxu1 %v1433_v10  ;;  %v68_v62 = vld [vmem:[#allocation2 + $0xc0] sm:$0xff]  ;;  %v1456_v3 = vld [vmem:[#allocation5 + $0x158] sm:$0xff]   ;;  %v1460_v9 = vld [vmem:[#allocation5 + $0x150] sm:$0xff]  }
  0x31   :  { %v116_v0 = vld [vmem:[#allocation2 + $0x240] sm:$0xff]  ;;  %v1457_v4 = vld [vmem:[#allocation5 + $0x98] sm:$0xff]   ;;  %v152_v6 = vpack.c.bf16 %v74_v63, %v68_v62  ;;  %v81_v10 = vld [vmem:[#allocation2 + $0x128] sm:$0xff] }
  0x32   :  { %v1458_v5 = vld [vmem:[#allocation5 + $0x118] sm:$0xff]   ;;  %v176_v7 = vpack.c.bf16 %v122_v1, %v116_v0  ;;  %v129_v12 = vld [vmem:[#allocation2 + $0x2a8] sm:$0xff]  ;;  %v1461_v13 = vld [vmem:[#allocation5 + $0x90] sm:$0xff]  }
  0x33   :  { %1219 = vmatpush3.bf16.msra.mxu0 %v1434_v17  ;;  %1413 = vmatpush3.bf16.msra.mxu1 %v1434_v17  ;;  %v87_v11 = vld [vmem:[#allocation2 + $0x158] sm:$0xff]  ;;  %v1462_v14 = vld [vmem:[#allocation5 + $0x110] sm:$0xff]   ;;  %v80_v17 = vld [vmem:[#allocation2 + $0x120] sm:$0xff] }
  0x34   :  { %1220 = vmatprep.subr.bf16.mxu0 %v1435_v18  ;;  %1406 = vmatprep.subr.bf16.mxu1 %v1435_v18  ;;  %v159_v15 = vpack.c.bf16 %v87_v11, %v81_v10  ;;  %v135_v16 = vld [vmem:[#allocation2 + $0x2d8] sm:$0xff]  ;;  %v86_v18 = vld [vmem:[#allocation2 + $0x150] sm:$0xff]  ;;  %v1463_v22 = vld [vmem:[#allocation5 + $0xc8] sm:$0xff]  }
  0x35   :  { %v1464_v23 = vld [vmem:[#allocation5 + $0x148] sm:$0xff]   ;;  %v158_v25 = vpack.c.bf16 %v86_v18, %v80_v17  ;;  %v1467_v28 = vld [vmem:[#allocation5 + $0xc0] sm:$0xff]   ;;  %v47_v32 = vld [vmem:[#allocation2 + $0x18] sm:$0xff] }
  0x36   :  { %v1465_v24 = vld [vmem:[#allocation5 + $0x88] sm:$0xff]   ;;  %v1468_v29 = vld [vmem:[#allocation5 + $0x140] sm:$0xff]   ;;  %v55_v35 = vld [vmem:[#allocation2 + $0x58] sm:$0xff] }
  0x37   :  { %1221 = vmatpush3.bf16.msra.mxu0 %v1436_v19  ;;  %1414 = vmatpush3.bf16.msra.mxu1 %v1436_v19  ;;  %v183_v19 = vpack.c.bf16 %v135_v16, %v129_v12  ;;  %v59_v42 = vld [vmem:[#allocation2 + $0x78] sm:$0xff]  ;;  %v65_v43 = vld [vmem:[#allocation2 + $0xa8] sm:$0xff]  ;;  %v64_v51 = vld [vmem:[#allocation2 + $0xa0] sm:$0xff] }
  0x38   :  { %1222 = vmatprep.subr.bf16.mxu0 %v1437_v20  ;;  %1407 = vmatprep.subr.bf16.mxu1 %v1437_v20  ;;  %v128_v20 = vld [vmem:[#allocation2 + $0x2a0] sm:$0xff]  ;;  %v149_v48 = vpack.c.bf16 %v65_v43, %v59_v42  ;;  %v66_v53 = vld [vmem:[#allocation2 + $0xb0] sm:$0xff]  ;;  %v97_v16 = vld [vmem:[#allocation2 + $0x1a8] sm:$0xff] }
  0x39   :  { %v60_v52 = vld [vmem:[#allocation2 + $0x80] sm:$0xff]  ;;  %v70_v62 = vld [vmem:[#allocation2 + $0xd0] sm:$0xff]  ;;  %v103_v17 = vld [vmem:[#allocation2 + $0x1d8] sm:$0xff] }
  0x3a   :  { %v76_v63 = vld [vmem:[#allocation2 + $0x100] sm:$0xff]  ;;  %v78_v1 = vld [vmem:[#allocation2 + $0x110] sm:$0xff] }
  0x3b   :  { %1223 = vmatpush3.bf16.msra.mxu0 %v1438_v21  ;;  %1415 = vmatpush3.bf16.msra.mxu1 %v1438_v21  ;;  %v134_v21 = vld [vmem:[#allocation2 + $0x2d0] sm:$0xff]  ;;  %v72_v0 = vld [vmem:[#allocation2 + $0xe0] sm:$0xff] }
  0x3c   :  { %1272 = vmatprep.subr.bf16.mxu1 %v1439_v26  ;;  %1336 = vmatprep.subr.bf16.mxu0 %v1440_v27  ;;  %v182_v26 = vpack.c.bf16 %v134_v21, %v128_v20  ;;  %v1466_v27 = vld [vmem:[#allocation5 + $0x108] sm:$0xff]   ;;  %v82_v10 = vld [vmem:[#allocation2 + $0x130] sm:$0xff]  ;;  %v88_v11 = vld [vmem:[#allocation2 + $0x160] sm:$0xff]  ;;  %v169_v21 = vpack.c.bf16 %v103_v17, %v97_v16 }
  0x3d   :  { %v84_v12 = vld [vmem:[#allocation2 + $0x140] sm:$0xff]  ;;  %v160_v18 = vpack.c.bf16 %v88_v11, %v82_v10 }
  0x3e   :  { %612 = vmatmul.mubr.bf16.vlgmr.msra.gmra.mxu0 %v140_v33  ;;  %644 = vmatmul.mubr.bf16.vlgmr.msra.gmra.mxu1 %v164_v34  ;;  %v53_v33 = vld [vmem:[#allocation2 + $0x48] sm:$0xff] }
  0x3f   :  { %1273 = vmatpush3.bf16.msra.mxu1 %v1441_v30  ;;  %1337 = vmatpush3.bf16.msra.mxu0 %v1442_v31  ;;  %v1469_v30 = vld [vmem:[#allocation5 + $0x80] sm:$0xff]   ;;  %v49_v34 = vld [vmem:[#allocation2 + $0x28] sm:$0xff] }
  0x40   :  { %1274 = vmatprep.subr.bf16.mxu1 %v1443_v36  ;;  %1338 = vmatprep.subr.bf16.mxu0 %v1444_v37  ;;  %v1470_v31 = vld [vmem:[#allocation5 + $0x100] sm:$0xff]   ;;  %v143_v36 = vpack.c.bf16 %v53_v33, %v47_v32  ;;  %v145_v37 = vpack.c.bf16 %v55_v35, %v49_v34  ;;  %v106_v34 = vld [vmem:[#allocation2 + $0x1f0] sm:$0xff] }
  0x41   :  { %619 = vmatprep.mubr.bf16.mxu0 %v147_v40  ;;  %651 = vmatprep.mubr.bf16.mxu1 %v171_v41  ;;  %v48_v40 = vld [vmem:[#allocation2 + $0x20] sm:$0xff]  ;;  %v54_v41 = vld [vmem:[#allocation2 + $0x50] sm:$0xff] }
  0x42   :  { %v144_v45 = vpack.c.bf16 %v54_v41, %v48_v40  ;;  %v112_v35 = vld [vmem:[#allocation2 + $0x220] sm:$0xff]  ;;  %v121_v40 = vld [vmem:[#allocation2 + $0x268] sm:$0xff]  ;;  %v127_v41 = vld [vmem:[#allocation2 + $0x298] sm:$0xff] }
  0x43   :  { %1275 = vmatpush3.bf16.msra.mxu1 %v1445_v38  ;;  %1339 = vmatpush3.bf16.msra.mxu0 %v1446_v39  ;;  %v46_v38 = vld [vmem:[#allocation2 + $0x10] sm:$0xff]  ;;  %v52_v39 = vld [vmem:[#allocation2 + $0x40] sm:$0xff]  ;;  %v172_v42 = vpack.c.bf16 %v112_v35, %v106_v34 }
  0x44   :  { %1276 = vmatprep.subr.bf16.mxu1 %v1447_v46  ;;  %1340 = vmatprep.subr.bf16.mxu0 %v1448_v47  ;;  %v142_v44 = vpack.c.bf16 %v52_v39, %v46_v38  ;;  %v61_v46 = vld [vmem:[#allocation2 + $0x88] sm:$0xff]  ;;  %v67_v47 = vld [vmem:[#allocation2 + $0xb8] sm:$0xff] }
  0x45   :  { %v119_v38 = vld [vmem:[#allocation2 + $0x258] sm:$0xff]  ;;  %v125_v39 = vld [vmem:[#allocation2 + $0x288] sm:$0xff] }
  0x46   :  { %620 = vmatmul.mubr.bf16.gmra.mxu0 %v146_v49  ;;  %652 = vmatmul.mubr.bf16.gmra.mxu1 %v170_v50  ;;  %v151_v49 = vpack.c.bf16 %v67_v47, %v61_v46  ;;  %v58_v50 = vld [vmem:[#allocation2 + $0x70] sm:$0xff]  ;;  %v124_v47 = vld [vmem:[#allocation2 + $0x280] sm:$0xff] }
  0x47   :  { %1277 = vmatpush3.bf16.msra.mxu1 %v1449_v54  ;;  %1341 = vmatpush3.bf16.msra.mxu0 %v1450_v55  ;;  %v71_v54 = vld [vmem:[#allocation2 + $0xd8] sm:$0xff]  ;;  %v77_v55 = vld [vmem:[#allocation2 + $0x108] sm:$0xff]  ;;  %v118_v46 = vld [vmem:[#allocation2 + $0x250] sm:$0xff] }
  0x48   :  { %1278 = vmatprep.subr.bf16.mxu1 %v1451_v56  ;;  %1342 = vmatprep.subr.bf16.mxu0 %v1452_v57  ;;  %v73_v56 = vld [vmem:[#allocation2 + $0xe8] sm:$0xff]  ;;  %v79_v57 = vld [vmem:[#allocation2 + $0x118] sm:$0xff] }
  0x49   :  { %627 = vmatprep.mubr.bf16.mxu0 %v153_v60  ;;  %659 = vmatprep.mubr.bf16.mxu1 %v177_v61  ;;  %v155_v60 = vpack.c.bf16 %v77_v55, %v71_v54  ;;  %v157_v61 = vpack.c.bf16 %v79_v57, %v73_v56  ;;  %v178_v54 = vpack.c.bf16 %v124_v47, %v118_v46 }
  0x4b   :  { %1279 = vmatpush3.bf16.msra.mxu1 %v1453_v58  ;;  %1343 = vmatpush3.bf16.msra.mxu0 %v1454_v59  ;;  %v148_v58 = vpack.c.bf16 %v64_v51, %v58_v50  ;;  %v150_v59 = vpack.c.bf16 %v66_v53, %v60_v52  ;;  %v131_v50 = vld [vmem:[#allocation2 + $0x2b8] sm:$0xff]  ;;  %v137_v51 = vld [vmem:[#allocation2 + $0x2e8] sm:$0xff] }
  0x4c   :  { %1280 = vmatprep.subr.bf16.mxu1 %v1455_v2  ;;  %1344 = vmatprep.subr.bf16.mxu0 %v1456_v3  ;;  %v83_v2 = vld [vmem:[#allocation2 + $0x138] sm:$0xff]  ;;  %v89_v3 = vld [vmem:[#allocation2 + $0x168] sm:$0xff]  ;;  %v185_v56 = vpack.c.bf16 %v137_v51, %v131_v50 }
  0x4d   :  { %v133_v52 = vld [vmem:[#allocation2 + $0x2c8] sm:$0xff]  ;;  %v139_v53 = vld [vmem:[#allocation2 + $0x2f8] sm:$0xff] }
  0x4e   :  { %628 = vmatmul.mubr.bf16.gmra.mxu0 %v152_v6  ;;  %660 = vmatmul.mubr.bf16.gmra.mxu1 %v176_v7  ;;  %v154_v6 = vpack.c.bf16 %v76_v63, %v70_v62  ;;  %v156_v7 = vpack.c.bf16 %v78_v1, %v72_v0  ;;  %v187_v57 = vpack.c.bf16 %v139_v53, %v133_v52 }
  0x4f   :  { %1281 = vmatpush3.bf16.msra.mxu1 %v1457_v4  ;;  %1345 = vmatpush3.bf16.msra.mxu0 %v1458_v5  ;;  %v85_v4 = vld [vmem:[#allocation2 + $0x148] sm:$0xff]  ;;  %v91_v5 = vld [vmem:[#allocation2 + $0x178] sm:$0xff] }
  0x50   :  { %1282 = vmatprep.subr.bf16.mxu1 %v1459_v8  ;;  %1346 = vmatprep.subr.bf16.mxu0 %v1460_v9  ;;  %v161_v8 = vpack.c.bf16 %v89_v3, %v83_v2  ;;  %v163_v9 = vpack.c.bf16 %v91_v5, %v85_v4 }
  0x51   :  { %635 = vmatprep.mubr.bf16.mxu0 %v159_v15  ;;  %667 = vmatprep.mubr.bf16.mxu1 %v183_v19  ;;  %v101_v15 = vld [vmem:[#allocation2 + $0x1c8] sm:$0xff] }
  0x53   :  { %1283 = vmatpush3.bf16.msra.mxu1 %v1461_v13  ;;  %1347 = vmatpush3.bf16.msra.mxu0 %v1462_v14  ;;  %v90_v13 = vld [vmem:[#allocation2 + $0x170] sm:$0xff]  ;;  %v95_v14 = vld [vmem:[#allocation2 + $0x198] sm:$0xff] }
  0x54   :  { %1284 = vmatprep.subr.bf16.mxu1 %v1463_v22  ;;  %1348 = vmatprep.subr.bf16.mxu0 %v1464_v23  ;;  %v162_v19 = vpack.c.bf16 %v90_v13, %v84_v12  ;;  %v167_v20 = vpack.c.bf16 %v101_v15, %v95_v14  ;;  %v94_v22 = vld [vmem:[#allocation2 + $0x190] sm:$0xff]  ;;  %v100_v23 = vld [vmem:[#allocation2 + $0x1c0] sm:$0xff] }
  0x56   :  { %636 = vmatmul.mubr.bf16.gmra.mxu0 %v158_v25  ;;  %668 = vmatmul.mubr.bf16.gmra.mxu1 %v182_v26  ;;  %v102_v25 = vld [vmem:[#allocation2 + $0x1d0] sm:$0xff]  ;;  %v107_v26 = vld [vmem:[#allocation2 + $0x1f8] sm:$0xff] }
  0x57   :  { %1285 = vmatpush3.bf16.msra.mxu1 %v1465_v24  ;;  %1349 = vmatpush3.bf16.msra.mxu0 %v1466_v27  ;;  %v96_v24 = vld [vmem:[#allocation2 + $0x1a0] sm:$0xff]  ;;  %v113_v27 = vld [vmem:[#allocation2 + $0x228] sm:$0xff] }
  0x58   :  { %1286 = vmatprep.subr.bf16.mxu1 %v1467_v28  ;;  %1350 = vmatprep.subr.bf16.mxu0 %v1468_v29  ;;  %v109_v28 = vld [vmem:[#allocation2 + $0x208] sm:$0xff]  ;;  %v115_v29 = vld [vmem:[#allocation2 + $0x238] sm:$0xff]  ;;  %v173_v32 = vpack.c.bf16 %v113_v27, %v107_v26 }
  0x59   :  { %708 = vmatprep.mubr.bf16.mxu1 %v143_v36  ;;  %805 = vmatprep.mubr.bf16.mxu0 %v145_v37  ;;  %v175_v33 = vpack.c.bf16 %v115_v29, %v109_v28  ;;  %v108_v36 = vld [vmem:[#allocation2 + $0x200] sm:$0xff]  ;;  %v114_v37 = vld [vmem:[#allocation2 + $0x230] sm:$0xff] }
  0x5a   :  { %v174_v43 = vpack.c.bf16 %v114_v37, %v108_v36 }
  0x5b   :  { %1287 = vmatpush3.bf16.msra.mxu1 %v1469_v30  ;;  %1351 = vmatpush3.bf16.msra.mxu0 %v1470_v31  ;;  %v166_v30 = vpack.c.bf16 %v100_v23, %v94_v22  ;;  %v168_v31 = vpack.c.bf16 %v102_v25, %v96_v24 }
  0x5e   :  { %709 = vmatmul.mubr.bf16.vlgmr.msra.gmra.mxu1 %v142_v44  ;;  %806 = vmatmul.mubr.bf16.vlgmr.msra.gmra.mxu0 %v144_v45  ;;  %v179_v44 = vpack.c.bf16 %v125_v39, %v119_v38  ;;  %v181_v45 = vpack.c.bf16 %v127_v41, %v121_v40 }
  0x5f   :  { %716 = vmatprep.mubr.bf16.mxu1 %v149_v48  ;;  %813 = vmatprep.mubr.bf16.mxu0 %v151_v49  ;;  %v120_v48 = vld [vmem:[#allocation2 + $0x260] sm:$0xff]  ;;  %v126_v49 = vld [vmem:[#allocation2 + $0x290] sm:$0xff] }
  0x60   :  { %v180_v55 = vpack.c.bf16 %v126_v49, %v120_v48 }
  0x66   :  { %717 = vmatmul.mubr.bf16.gmra.mxu1 %v148_v58  ;;  %814 = vmatmul.mubr.bf16.gmra.mxu0 %v150_v59  ;;  %v130_v58 = vld [vmem:[#allocation2 + $0x2b0] sm:$0xff]  ;;  %v136_v59 = vld [vmem:[#allocation2 + $0x2e0] sm:$0xff] }
  0x67   :  { %724 = vmatprep.mubr.bf16.mxu1 %v155_v60  ;;  %821 = vmatprep.mubr.bf16.mxu0 %v157_v61  ;;  %v132_v60 = vld [vmem:[#allocation2 + $0x2c0] sm:$0xff]  ;;  %v138_v61 = vld [vmem:[#allocation2 + $0x2f0] sm:$0xff]  ;;  %v184_v62 = vpack.c.bf16 %v136_v59, %v130_v58 }
  0x68   :  { %v186_v63 = vpack.c.bf16 %v138_v61, %v132_v60 }
  0x6e   :  { %725 = vmatmul.mubr.bf16.gmra.mxu1 %v154_v6  ;;  %822 = vmatmul.mubr.bf16.gmra.mxu0 %v156_v7 }
  0x6f   :  { %732 = vmatprep.mubr.bf16.mxu1 %v161_v8  ;;  %829 = vmatprep.mubr.bf16.mxu0 %v163_v9 }
  0x76   :  { %733 = vmatmul.mubr.bf16.gmra.mxu1 %v160_v18  ;;  %830 = vmatmul.mubr.bf16.gmra.mxu0 %v162_v19 }
  0x77   :  { %740 = vmatprep.mubr.bf16.mxu1 %v167_v20  ;;  %837 = vmatprep.mubr.bf16.mxu0 %v169_v21 }
  0x7e   :  { %741 = vmatmul.mubr.bf16.gmra.mxu1 %v166_v30  ;;  %838 = vmatmul.mubr.bf16.gmra.mxu0 %v168_v31 }
  0x7f   :  { %748 = vmatprep.mubr.bf16.mxu1 %v173_v32  ;;  %845 = vmatprep.mubr.bf16.mxu0 %v175_v33  ;;  %v1650_v33 = vld [vmem:[%s1777_s2] ss:$0 sm:$0xff]  ;;  %s1575_s2 = smov [#allocation7]  }
  0x80   :  { %s1067_s26 = sshll.u32 %s1575_s2, 4  ;;  %s1068_s26 = int_to_ptr.vmem [resolvable:$true] %s1067_s26 }
  0x81   :  { %s1543_s27 = scalar_lea.vmem %s1068_s26, 1024  ;;  %p1548_p11 = scmp.lt.s32.totalorder %s1068_s26, %s1068_s26 }
  0x82   :  { %p1544_p10 = scmp.ne.s32.totalorder %s1068_s26, %s1543_s27  ;;  %p1549_p12 = scmp.lt.s32.totalorder %s1543_s27, %s1543_s27 }
  0x84   :  { %p1550_p13 = por %p1549_p12, %p1548_p11 }
  0x86   :  { %749 = vmatmul.mubr.bf16.gmra.mxu1 %v172_v42  ;;  %846 = vmatmul.mubr.bf16.gmra.mxu0 %v174_v43  ;;  %p1551_p0 = pnand %p1550_p13, %p1544_p10 }
  0x87   :  { %756 = vmatprep.mubr.bf16.mxu1 %v179_v44  ;;  %853 = vmatprep.mubr.bf16.mxu0 %v181_v45 }
  0x8e   :  { %757 = vmatmul.mubr.bf16.gmra.mxu1 %v178_v54  ;;  %854 = vmatmul.mubr.bf16.gmra.mxu0 %v180_v55 }
  0x8f   :  { %764 = vmatprep.mubr.bf16.mxu1 %v185_v56  ;;  %861 = vmatprep.mubr.bf16.mxu0 %v187_v57 }
  0x96   :  { %765 = vmatmul.mubr.bf16.gmra.mxu1 %v184_v62  ;;  %862 = vmatmul.mubr.bf16.gmra.mxu0 %v186_v63 }
  0xfe   :  { %v1224_v0 = vpop.f32.mrf.mxu0  ;;  %v1605_v1 = vpop.f32.mrf.mxu1 }
 0x100   :  { %v1225_v2 = vpop.f32.mrf.mxu0  ;;  %v1607_v3 = vpop.f32.mrf.mxu1 }
 0x101   :  { %v1226_v32 = vadd.f32 %v1225_v2, %v1224_v0 }
 0x102   :  { %v1227_v4 = vpop.f32.mrf.mxu0  ;;  %v1609_v5 = vpop.f32.mrf.mxu1 }
 0x103   :  { %v614_v38 = vadd.f32 %v1226_v32, %v1650_v33 }
 0x104   :  { %v1228_v6 = vpop.f32.mrf.mxu0  ;;  %v1611_v7 = vpop.f32.mrf.mxu1 }
 0x105   :  { %v1229_v39 = vadd.f32 %v1228_v6, %v1227_v4 }
 0x106   :  { %v1230_v8 = vpop.f32.mrf.mxu0  ;;  %v1613_v9 = vpop.f32.mrf.mxu1 }
 0x107   :  { %v617_v47 = vadd.f32 %v1229_v39, %v1650_v33 }
 0x108   :  { %v1231_v10 = vpop.f32.mrf.mxu0  ;;  %v1615_v11 = vpop.f32.mrf.mxu1 }
 0x109   :  { %v1232_v48 = vadd.f32 %v1231_v10, %v1230_v8 }
 0x10a   :  { %v1233_v12 = vpop.f32.mrf.mxu0  ;;  %v1617_v13 = vpop.f32.mrf.mxu1 }
 0x10b   :  { %v622_v58 = vadd.f32 %v1232_v48, %v1650_v33 }
 0x10c   :  { %v1234_v14 = vpop.f32.mrf.mxu0  ;;  %v1619_v15 = vpop.f32.mrf.mxu1 }
 0x10d   :  { %v1235_v59 = vadd.f32 %v1234_v14, %v1233_v12 }
 0x10e   :  { %v1236_v16 = vpop.f32.mrf.mxu0  ;;  %v1621_v17 = vpop.f32.mrf.mxu1 }
 0x10f   :  { %v625_v10 = vadd.f32 %v1235_v59, %v1650_v33 }
 0x110   :  { %v1237_v18 = vpop.f32.mrf.mxu0  ;;  %v1623_v19 = vpop.f32.mrf.mxu1 }
 0x111   :  { %v1238_v32 = vadd.f32 %v1237_v18, %v1236_v16 }
 0x112   :  { %v1625_v20 = vpop.f32.mrf.mxu0  ;;  %v1627_v21 = vpop.f32.mrf.mxu1 }
 0x114   :  { %v1240_v22 = vpop.f32.mrf.mxu0  ;;  %v1629_v23 = vpop.f32.mrf.mxu1 }
 0x116   :  { %v1631_v24 = vpop.f32.mrf.mxu0  ;;  %v1633_v25 = vpop.f32.mrf.mxu1 }
 0x118   :  { %v1635_v26 = vpop.f32.mrf.mxu0  ;;  %v1637_v27 = vpop.f32.mrf.mxu1 }
 0x11a   :  { %v1639_v28 = vpop.f32.mrf.mxu0  ;;  %v1641_v29 = vpop.f32.mrf.mxu1 }
 0x11c   :  { %v1643_v30 = vpop.f32.mrf.mxu0  ;;  %v1645_v31 = vpop.f32.mrf.mxu1 }
 0x11e   :  { %v1288_v34 = vpop.f32.mrf.mxu1  ;;  %v1352_v35 = vpop.f32.mrf.mxu0 }
 0x120   :  { %v1289_v36 = vpop.f32.mrf.mxu1  ;;  %v1353_v37 = vpop.f32.mrf.mxu0 }
 0x121   :  { %v1290_v40 = vadd.f32 %v1289_v36, %v1288_v34  ;;  %v1354_v44 = vadd.f32 %v1353_v37, %v1352_v35 }
 0x122   :  { %v1291_v41 = vpop.f32.mrf.mxu1  ;;  %v1355_v42 = vpop.f32.mrf.mxu0 }
 0x123   :  { %v711_v43 = vadd.f32 %v1290_v40, %v614_v38 }
 0x124   :  { %v1292_v45 = vpop.f32.mrf.mxu1  ;;  %v1356_v46 = vpop.f32.mrf.mxu0 }
 0x125   :  { %v1293_v49 = vadd.f32 %v1292_v45, %v1291_v41  ;;  %v1654_v50 = vadd.f32 %v1354_v44, %v711_v43  ;;  %v1357_v54 = vadd.f32 %v1356_v46, %v1355_v42  ;;  %v630_v41 = vadd.f32 %v1238_v32, %v1650_v33 }
 0x126   :  { %v1294_v51 = vpop.f32.mrf.mxu1  ;;  %v1358_v52 = vpop.f32.mrf.mxu0  ;;  %v1241_v42 = vadd.f32 %v1240_v22, %v1625_v20  ;;  %v1250_v32 = vadd.f32 %v1607_v3, %v1605_v1  ;;  %v1253_v1 = vadd.f32 %v1611_v7, %v1609_v5 }
 0x127   :  { %v714_v53 = vadd.f32 %v1293_v49, %v617_v47  ;;  %v870_v55 = vmul.f32 %v1654_v50, %v1654_v50 }
 0x128   :  { %v1295_v56 = vpop.f32.mrf.mxu1  ;;  %v1359_v57 = vpop.f32.mrf.mxu0 }
 0x129   :  { %v1659_v60 = vadd.f32 %v1357_v54, %v714_v53  ;;  %v1296_v61 = vadd.f32 %v1295_v56, %v1294_v51  ;;  %886 = vadd.xlane.f32.xlu0 %v870_v55  ;;  %v1360_v2 = vadd.f32 %v1359_v57, %v1358_v52  ;;  %v633_v51 = vadd.f32 %v1241_v42, %v1650_v33 }
 0x12a   :  { %v1297_v62 = vpop.f32.mrf.mxu1  ;;  %v1361_v63 = vpop.f32.mrf.mxu0  ;;  %v1244_v52 = vadd.f32 %v1635_v26, %v1631_v24 }
 0x12b   :  { %v719_v0 = vadd.f32 %v1296_v61, %v622_v58  ;;  %v871_v4 = vmul.f32 %v1659_v60, %v1659_v60 }
 0x12c   :  { %v1298_v6 = vpop.f32.mrf.mxu1  ;;  %v1362_v8 = vpop.f32.mrf.mxu0  ;;  %v638_v61 = vadd.f32 %v1244_v52, %v1650_v33 }
 0x12d   :  { %v1299_v34 = vadd.f32 %v1298_v6, %v1297_v62  ;;  %888 = vadd.xlane.f32.xlu0 %v871_v4  ;;  %v1664_v35 = vadd.f32 %v1360_v2, %v719_v0  ;;  %v1363_v37 = vadd.f32 %v1362_v8, %v1361_v63  ;;  %v1247_v62 = vadd.f32 %v1643_v30, %v1639_v28 }
 0x12e   :  { %v1300_v12 = vpop.f32.mrf.mxu1  ;;  %v1364_v14 = vpop.f32.mrf.mxu0 }
 0x12f   :  { %v722_v36 = vadd.f32 %v1299_v34, %v625_v10  ;;  %v872_v38 = vmul.f32 %v1664_v35, %v1664_v35  ;;  %v641_v34 = vadd.f32 %v1247_v62, %v1650_v33 }
 0x130   :  { %v1301_v39 = vpop.f32.mrf.mxu1  ;;  %v1365_v40 = vpop.f32.mrf.mxu0 }
 0x131   :  { %v1670_v43 = vadd.f32 %v1363_v37, %v722_v36  ;;  %v1302_v16 = vadd.f32 %v1301_v39, %v1300_v12  ;;  %890 = vadd.xlane.f32.xlu1 %v872_v38  ;;  %v1366_v46 = vadd.f32 %v1365_v40, %v1364_v14 }
 0x132   :  { %v1303_v18 = vpop.f32.mrf.mxu1  ;;  %v1367_v44 = vpop.f32.mrf.mxu0 }
 0x133   :  { %v727_v45 = vadd.f32 %v1302_v16, %v630_v41  ;;  %v873_v47 = vmul.f32 %v1670_v43, %v1670_v43  ;;  %v646_v41 = vadd.f32 %v1250_v32, %v1650_v33 }
 0x134   :  { %v1304_v48 = vpop.f32.mrf.mxu1  ;;  %v1368_v49 = vpop.f32.mrf.mxu0 }
 0x135   :  { %v1677_v53 = vadd.f32 %v1366_v46, %v727_v45  ;;  %v1305_v20 = vadd.f32 %v1304_v48, %v1303_v18  ;;  %892 = vadd.xlane.f32.xlu1 %v873_v47  ;;  %v1369_v56 = vadd.f32 %v1368_v49, %v1367_v44  ;;  %v649_v49 = vadd.f32 %v1253_v1, %v1650_v33 }
 0x136   :  { %v1306_v22 = vpop.f32.mrf.mxu1  ;;  %v1370_v54 = vpop.f32.mrf.mxu0 }
 0x137   :  { %v730_v55 = vadd.f32 %v1305_v20, %v633_v51  ;;  %v874_v57 = vmul.f32 %v1677_v53, %v1677_v53  ;;  %v1256_v51 = vadd.f32 %v1615_v11, %v1613_v9 }
 0x138   :  { %v1307_v58 = vpop.f32.mrf.mxu1  ;;  %v1371_v59 = vpop.f32.mrf.mxu0 }
 0x139   :  { %v1684_v63 = vadd.f32 %v1369_v56, %v730_v55  ;;  %v1308_v24 = vadd.f32 %v1307_v58, %v1306_v22  ;;  %894 = vadd.xlane.f32.xlu0 %v874_v57  ;;  %v1372_v4 = vadd.f32 %v1371_v59, %v1370_v54  ;;  %v654_v58 = vadd.f32 %v1256_v51, %v1650_v33 }
 0x13a   :  { %v1309_v26 = vpop.f32.mrf.mxu1  ;;  %v1373_v0 = vpop.f32.mrf.mxu0  ;;  %v1259_v59 = vadd.f32 %v1619_v15, %v1617_v13 }
 0x13b   :  { %v735_v2 = vadd.f32 %v1308_v24, %v638_v61  ;;  %v875_v6 = vmul.f32 %v1684_v63, %v1684_v63 }
 0x13c   :  { %v1310_v8 = vpop.f32.mrf.mxu1  ;;  %v1374_v10 = vpop.f32.mrf.mxu0 }
 0x13d   :  { %v1691_v12 = vadd.f32 %v1372_v4, %v735_v2  ;;  %v1311_v28 = vadd.f32 %v1310_v8, %v1309_v26  ;;  %896 = vadd.xlane.f32.xlu1 %v875_v6  ;;  %v1375_v37 = vadd.f32 %v1374_v10, %v1373_v0  ;;  %v657_v6 = vadd.f32 %v1259_v59, %v1650_v33 }
 0x13e   :  { %v1312_v30 = vpop.f32.mrf.mxu1  ;;  %v1376_v14 = vpop.f32.mrf.mxu0  ;;  %v1262_v8 = vadd.f32 %v1623_v19, %v1621_v17 }
 0x13f   :  { %v738_v36 = vadd.f32 %v1311_v28, %v641_v34  ;;  %v876_v38 = vmul.f32 %v1691_v12, %v1691_v12 }
 0x140   :  { %v1313_v39 = vpop.f32.mrf.mxu1  ;;  %v1377_v40 = vpop.f32.mrf.mxu0 }
 0x141   :  { %v1698_v3 = vadd.f32 %v1375_v37, %v738_v36  ;;  %v1314_v42 = vadd.f32 %v1313_v39, %v1312_v30  ;;  %898 = vadd.xlane.f32.xlu0 %v876_v38  ;;  %v1378_v45 = vadd.f32 %v1377_v40, %v1376_v14  ;;  %v662_v37 = vadd.f32 %v1262_v8, %v1650_v33 }
 0x142   :  { %v1315_v16 = vpop.f32.mrf.mxu1  ;;  %v1379_v18 = vpop.f32.mrf.mxu0  ;;  %v1265_v38 = vadd.f32 %v1629_v23, %v1627_v21 }
 0x143   :  { %v743_v44 = vadd.f32 %v1314_v42, %v646_v41  ;;  %v877_v46 = vmul.f32 %v1698_v3, %v1698_v3 }
 0x144   :  { %v1316_v47 = vpop.f32.mrf.mxu1  ;;  %v1380_v48 = vpop.f32.mrf.mxu0 }
 0x145   :  { %v1705_v52 = vadd.f32 %v1378_v45, %v743_v44  ;;  %v1317_v5 = vadd.f32 %v1316_v47, %v1315_v16  ;;  %900 = vadd.xlane.f32.xlu1 %v877_v46  ;;  %v1381_v54 = vadd.f32 %v1380_v48, %v1379_v18  ;;  %v665_v44 = vadd.f32 %v1265_v38, %v1650_v33 }
 0x146   :  { %v1318_v7 = vpop.f32.mrf.mxu1  ;;  %v1382_v20 = vpop.f32.mrf.mxu0  ;;  %v1268_v45 = vadd.f32 %v1637_v27, %v1633_v25 }
 0x147   :  { %v746_v22 = vadd.f32 %v1317_v5, %v649_v49  ;;  %v878_v55 = vmul.f32 %v1705_v52, %v1705_v52 }
 0x148   :  { %v1319_v56 = vpop.f32.mrf.mxu1  ;;  %v1383_v57 = vpop.f32.mrf.mxu0 }
 0x149   :  { %v1712_v61 = vadd.f32 %v1381_v54, %v746_v22  ;;  %v1320_v9 = vadd.f32 %v1319_v56, %v1318_v7  ;;  %902 = vadd.xlane.f32.xlu0 %v878_v55  ;;  %v1384_v26 = vadd.f32 %v1383_v57, %v1382_v20  ;;  %v670_v20 = vadd.f32 %v1268_v45, %v1650_v33 }
 0x14a   :  { %v1321_v11 = vpop.f32.mrf.mxu1  ;;  %v1385_v62 = vpop.f32.mrf.mxu0  ;;  %v1271_v22 = vadd.f32 %v1645_v31, %v1641_v29 }
 0x14b   :  { %v751_v24 = vadd.f32 %v1320_v9, %v654_v58  ;;  %v879_v0 = vmul.f32 %v1712_v61, %v1712_v61 }
 0x14c   :  { %v1322_v2 = vpop.f32.mrf.mxu1  ;;  %v1386_v4 = vpop.f32.mrf.mxu0 }
 0x14d   :  { %v1719_v10 = vadd.f32 %v1384_v26, %v751_v24  ;;  %v1323_v13 = vadd.f32 %v1322_v2, %v1321_v11  ;;  %904 = vadd.xlane.f32.xlu1 %v879_v0  ;;  %v1387_v28 = vadd.f32 %v1386_v4, %v1385_v62  ;;  %v673_v11 = vadd.f32 %v1271_v22, %v1650_v33 }
 0x14e   :  { %v1324_v15 = vpop.f32.mrf.mxu1  ;;  %v1388_v32 = vpop.f32.mrf.mxu0 }
 0x14f   :  { %v754_v34 = vadd.f32 %v1323_v13, %v657_v6  ;;  %v880_v30 = vmul.f32 %v1719_v10, %v1719_v10 }
 0x150   :  { %v1325_v14 = vpop.f32.mrf.mxu1  ;;  %v1389_v36 = vpop.f32.mrf.mxu0 }
 0x151   :  { %v1726_v39 = vadd.f32 %v1387_v28, %v754_v34  ;;  %v1326_v17 = vadd.f32 %v1325_v14, %v1324_v15  ;;  %906 = vadd.xlane.f32.xlu0 %v880_v30  ;;  %v1390_v1 = vadd.f32 %v1389_v36, %v1388_v32 }
 0x152   :  { %v1327_v19 = vpop.f32.mrf.mxu1  ;;  %v1391_v40 = vpop.f32.mrf.mxu0 }
 0x153   :  { %v759_v41 = vadd.f32 %v1326_v17, %v662_v37  ;;  %v881_v42 = vmul.f32 %v1726_v39, %v1726_v39 }
 0x154   :  { %v1328_v16 = vpop.f32.mrf.mxu1  ;;  %v1392_v18 = vpop.f32.mrf.mxu0 }
 0x155   :  { %v1733_v46 = vadd.f32 %v1390_v1, %v759_v41  ;;  %v1329_v21 = vadd.f32 %v1328_v16, %v1327_v19  ;;  %908 = vadd.xlane.f32.xlu1 %v881_v42  ;;  %v1393_v49 = vadd.f32 %v1392_v18, %v1391_v40 }
 0x156   :  { %v1330_v23 = vpop.f32.mrf.mxu1  ;;  %v1394_v47 = vpop.f32.mrf.mxu0 }
 0x157   :  { %v762_v48 = vadd.f32 %v1329_v21, %v665_v44  ;;  %v882_v51 = vmul.f32 %v1733_v46, %v1733_v46 }
 0x158   :  { %v1331_v5 = vpop.f32.mrf.mxu1  ;;  %v1395_v7 = vpop.f32.mrf.mxu0 }
 0x159   :  { %v1740_v54 = vadd.f32 %v1393_v49, %v762_v48  ;;  %v1332_v25 = vadd.f32 %v1331_v5, %v1330_v23  ;;  %910 = vadd.xlane.f32.xlu0 %v882_v51  ;;  %v1396_v57 = vadd.f32 %v1395_v7, %v1394_v47 }
 0x15a   :  { %v1333_v27 = vpop.f32.mrf.mxu1  ;;  %v1397_v55 = vpop.f32.mrf.mxu0 }
 0x15b   :  { %v767_v56 = vadd.f32 %v1332_v25, %v670_v20  ;;  %v883_v58 = vmul.f32 %v1740_v54, %v1740_v54 }
 0x15c   :  { %v1334_v59 = vpop.f32.mrf.mxu1  ;;  %v1398_v9 = vpop.f32.mrf.mxu0 }
 0x15d   :  { %v1745_v62 = vadd.f32 %v1396_v57, %v767_v56  ;;  %v1335_v24 = vadd.f32 %v1334_v59, %v1333_v27  ;;  %912 = vadd.xlane.f32.xlu1 %v883_v58  ;;  %v1399_v31 = vadd.f32 %v1398_v9, %v1397_v55 }
 0x15f   :  { %v770_v29 = vadd.f32 %v1335_v24, %v673_v11  ;;  %v884_v26 = vmul.f32 %v1745_v62, %v1745_v62 }
 0x161   :  { %v1749_v0 = vadd.f32 %v1399_v31, %v770_v29  ;;  %914 = vadd.xlane.f32.xlu0 %v884_v26 }
 0x163   :  { %v885_v2 = vmul.f32 %v1749_v0, %v1749_v0 }
 0x165   :  { %916 = vadd.xlane.f32.xlu1 %v885_v2 }
 0x1b2   :  { %v887_v4 = vpop.xlane.xlu0 %886 }
 0x1b3   :  { %1471 = vrsqrt.f32 %v887_v4 }
 0x1b6   :  { %v889_v6 = vpop.xlane.xlu0 %888 }
 0x1b7   :  { %1473 = vrsqrt.f32 %v889_v6 }
 0x1ba   :  { %v891_v33 = vpop.xlane.xlu1 %890 }
 0x1bb   :  { %1475 = vrsqrt.f32 %v891_v33 }
 0x1be   :  { %v893_v8 = vpop.xlane.xlu1 %892 }
 0x1bf   :  { %1477 = vrsqrt.f32 %v893_v8 }
 0x1c0   :  { %v1472_v13 = vpop.eup %1471 }
 0x1c1   :  { %v934_v15 = vmul.f32 %v1472_v13, %v1654_v50 }
 0x1c2   :  { %v895_v32 = vpop.xlane.xlu0 %894 }
 0x1c3   :  { %1479 = vrsqrt.f32 %v895_v32  ;;  %950 = vxpose.xlu0.b32.start [1/16] %v934_v15, 128 }
 0x1c4   :  { %v1474_v34 = vpop.eup %1473 }
 0x1c5   :  { %v935_v28 = vmul.f32 %v1474_v34, %v1659_v60 }
 0x1c6   :  { %v897_v30 = vpop.xlane.xlu1 %896 }
 0x1c7   :  { %1481 = vrsqrt.f32 %v897_v30  ;;  %951 = vxpose.xlu0.b32.cont [2/16] %v935_v28, 128 }
 0x1c8   :  { %v1476_v14 = vpop.eup %1475 }
 0x1c9   :  { %v936_v36 = vmul.f32 %v1476_v14, %v1664_v35 }
 0x1ca   :  { %v899_v37 = vpop.xlane.xlu0 %898 }
 0x1cb   :  { %1483 = vrsqrt.f32 %v899_v37  ;;  %952 = vxpose.xlu0.b32.cont [3/16] %v936_v36, 128 }
 0x1cc   :  { %v1478_v38 = vpop.eup %1477 }
 0x1cd   :  { %v937_v17 = vmul.f32 %v1478_v38, %v1670_v43 }
 0x1ce   :  { %v901_v19 = vpop.xlane.xlu1 %900 }
 0x1cf   :  { %1485 = vrsqrt.f32 %v901_v19  ;;  %953 = vxpose.xlu0.b32.cont [4/16] %v937_v17, 128 }
 0x1d0   :  { %v1480_v50 = vpop.eup %1479 }
 0x1d1   :  { %v938_v40 = vmul.f32 %v1480_v50, %v1677_v53 }
 0x1d2   :  { %v903_v41 = vpop.xlane.xlu0 %902 }
 0x1d3   :  { %1487 = vrsqrt.f32 %v903_v41  ;;  %954 = vxpose.xlu0.b32.cont [5/16] %v938_v40, 128 }
 0x1d4   :  { %v1482_v60 = vpop.eup %1481 }
 0x1d5   :  { %v939_v1 = vmul.f32 %v1482_v60, %v1684_v63 }
 0x1d6   :  { %v905_v42 = vpop.xlane.xlu1 %904 }
 0x1d7   :  { %1489 = vrsqrt.f32 %v905_v42  ;;  %955 = vxpose.xlu0.b32.cont [6/16] %v939_v1, 128 }
 0x1d8   :  { %v1484_v35 = vpop.eup %1483 }
 0x1d9   :  { %v940_v16 = vmul.f32 %v1484_v35, %v1691_v12 }
 0x1da   :  { %v907_v18 = vpop.xlane.xlu0 %906 }
 0x1db   :  { %1491 = vrsqrt.f32 %v907_v18  ;;  %956 = vxpose.xlu0.b32.cont [7/16] %v940_v16, 128 }
 0x1dc   :  { %v1486_v43 = vpop.eup %1485 }
 0x1dd   :  { %v941_v44 = vmul.f32 %v1486_v43, %v1698_v3 }
 0x1de   :  { %v909_v45 = vpop.xlane.xlu1 %908 }
 0x1df   :  { %1493 = vrsqrt.f32 %v909_v45  ;;  %957 = vxpose.xlu0.b32.cont [8/16] %v941_v44, 128 }
 0x1e0   :  { %v1488_v53 = vpop.eup %1487 }
 0x1e1   :  { %v942_v21 = vmul.f32 %v1488_v53, %v1705_v52 }
 0x1e2   :  { %v911_v23 = vpop.xlane.xlu0 %910 }
 0x1e3   :  { %1495 = vrsqrt.f32 %v911_v23  ;;  %958 = vxpose.xlu0.b32.cont [9/16] %v942_v21, 128 }
 0x1e4   :  { %v1490_v63 = vpop.eup %1489 }
 0x1e5   :  { %v943_v47 = vmul.f32 %v1490_v63, %v1712_v61 }
 0x1e6   :  { %v913_v48 = vpop.xlane.xlu1 %912 }
 0x1e7   :  { %1497 = vrsqrt.f32 %v913_v48  ;;  %959 = vxpose.xlu0.b32.cont [10/16] %v943_v47, 128 }
 0x1e8   :  { %v1492_v12 = vpop.eup %1491 }
 0x1e9   :  { %v944_v49 = vmul.f32 %v1492_v12, %v1719_v10 }
 0x1ea   :  { %v915_v51 = vpop.xlane.xlu0 %914 }
 0x1eb   :  { %1499 = vrsqrt.f32 %v915_v51  ;;  %960 = vxpose.xlu0.b32.cont [11/16] %v944_v49, 128 }
 0x1ec   :  { %v1494_v3 = vpop.eup %1493 }
 0x1ed   :  { %v945_v5 = vmul.f32 %v1494_v3, %v1726_v39 }
 0x1ee   :  { %v917_v7 = vpop.xlane.xlu1 %916 }
 0x1ef   :  { %1501 = vrsqrt.f32 %v917_v7  ;;  %961 = vxpose.xlu0.b32.cont [12/16] %v945_v5, 128 }
 0x1f0   :  { %v1496_v52 = vpop.eup %1495 }
 0x1f1   :  { %v946_v20 = vmul.f32 %v1496_v52, %v1733_v46 }
 0x1f3   :  { %962 = vxpose.xlu0.b32.cont [13/16] %v946_v20, 128 }
 0x1f4   :  { %v1498_v61 = vpop.eup %1497 }
 0x1f5   :  { %v947_v22 = vmul.f32 %v1498_v61, %v1740_v54 }
 0x1f7   :  { %963 = vxpose.xlu0.b32.cont [14/16] %v947_v22, 128 }
 0x1f8   :  { %v1500_v25 = vpop.eup %1499 }
 0x1f9   :  { %v948_v10 = vmul.f32 %v1500_v25, %v1745_v62 }
 0x1fb   :  { %964 = vxpose.xlu0.b32.cont [15/16] %v948_v10, 128 }
 0x1fc   :  { %v1502_v27 = vpop.eup %1501 }
 0x1fd   :  { %v949_v55 = vmul.f32 %v1502_v27, %v1749_v0 }
 0x1ff   :  { %965 = vxpose.xlu0.b32.end [16/16] %v949_v55, 128 }
 0x23f   :  { %v966_v39 = vpop.trf.xlu0 }
 0x243   :  { %v967_v56 = vpop.trf.xlu0 }
 0x244   :  { %v1164_v57 = vpack.c.bf16 %v967_v56, %v966_v39 }
 0x246   :  { %1165 = vst [vmem:[#allocation7] sm:$0xff] %v1164_v57  }
 0x247   :  { %v968_v58 = vpop.trf.xlu0 }
 0x24b   :  { %v969_v59 = vpop.trf.xlu0 }
 0x24c   :  { %v1169_v46 = vpack.c.bf16 %v969_v59, %v968_v58 }
 0x24e   :  { %1201 = vst [vmem:[#allocation7 + $0x8] sm:$0xff] %v1169_v46  }
 0x24f   :  { %v970_v9 = vpop.trf.xlu0 }
 0x253   :  { %v971_v11 = vpop.trf.xlu0 }
 0x254   :  { %v1174_v54 = vpack.c.bf16 %v971_v11, %v970_v9 }
 0x256   :  { %1202 = vst [vmem:[#allocation7 + $0x10] sm:$0xff] %v1174_v54  }
 0x257   :  { %v972_v24 = vpop.trf.xlu0 }
 0x25b   :  { %v973_v29 = vpop.trf.xlu0 }
 0x25c   :  { %v1179_v62 = vpack.c.bf16 %v973_v29, %v972_v24 }
 0x25e   :  { %1203 = vst [vmem:[#allocation7 + $0x18] sm:$0xff] %v1179_v62  }
 0x25f   :  { %v974_v31 = vpop.trf.xlu0 }
 0x263   :  { %v975_v26 = vpop.trf.xlu0 }
 0x264   :  { %v1184_v0 = vpack.c.bf16 %v975_v26, %v974_v31 }
 0x266   :  { %1204 = vst [vmem:[#allocation7 + $0x20] sm:$0xff] %v1184_v0  }
 0x267   :  { %v976_v2 = vpop.trf.xlu0 }
 0x26b   :  { %v977_v4 = vpop.trf.xlu0 }
 0x26c   :  { %v1189_v6 = vpack.c.bf16 %v977_v4, %v976_v2 }
 0x26e   :  { %1205 = vst [vmem:[#allocation7 + $0x28] sm:$0xff] %v1189_v6  }
 0x26f   :  { %v978_v33 = vpop.trf.xlu0 }
 0x273   :  { %v979_v8 = vpop.trf.xlu0 }
 0x274   :  { %v1194_v13 = vpack.c.bf16 %v979_v8, %v978_v33 }
 0x276   :  { %1206 = vst [vmem:[#allocation7 + $0x30] sm:$0xff] %v1194_v13  }
 0x277   :  { %v980_v15 = vpop.trf.xlu0 }
 0x27b   :  { %v981_v32 = vpop.trf.xlu0 }
 0x27c   :  { %v1199_v34 = vpack.c.bf16 %v981_v32, %v980_v15 }
 0x27e   :  { %1207 = vst [vmem:[#allocation7 + $0x38] sm:$0xff] %v1199_v34  }
 0x27f   :  { %1554 = shalt.err (!%p1551_p0)
}
 0x280   :  { %1073 = dma.vmem_to_hbm [thread:$0]  %s1068_s26, 1024, %s1778_s3, [#allocation4], %s1573_s22, %s1573_s22, %s1574_s23  }
 0x281   :  { %1567 = dma.done.wait [#allocation4], 1024  }
 0x282   :  { %1568 = vsyncadd [#allocation4], 4294966272 }
 0x283   :  { %1077 = vsyncpa [#allocation3], 1 }
 0x284   :  { %1078 = vsyncpa [#allocation6], 1 }
 0x285   :  { %1079 = vsyncpa [#allocation4], 1 }

</bundles_post_ra>
